<compile_context>
chip_gen: v5e
topology: v5e:2x2
jax: 0.10.0
libtpu: 0.0.40
codegen_flags: <defaults>
</compile_context>

<pallas_src>
import functools

import jax
import jax.numpy as jnp
import numpy as np
from jax import lax
from jax.experimental import pallas as pl
from jax.experimental.pallas import tpu as pltpu

_LANE = 128
_BOXES_PER_ROW = _LANE // 4  # 32 boxes per 128-lane row


def _cdiv(a, b):
    return -(-a // b)


def _round_up(x, m):
    return _cdiv(x, m) * m


def _make_bbox_kernel(mean4, std4):
    mean4 = tuple(float(v) for v in mean4)
    std4 = tuple(float(v) for v in std4)

    def kernel(boxes_ref, deltas_ref, out_ref):
        # Blocks: (tile_rows, 128), interleaved [x1,y1,x2,y2,...] along lanes.
        b = boxes_ref[...].astype(jnp.float32)
        d = deltas_ref[...].astype(jnp.float32)

        lane = lax.broadcasted_iota(jnp.int32, (1, _LANE), 1)
        c = lane & 3  # coordinate slot per lane: 0=x1, 1=y1, 2=x2, 3=y2

        def lane_periodic(v):  # (1, 128) vector with v[c] in each lane
            return jnp.where(c == 0, v[0],
                             jnp.where(c == 1, v[1],
                                       jnp.where(c == 2, v[2], v[3])))

        mean_lane = lane_periodic(mean4)
        std_lane = lane_periodic(std4)

        # Un-normalize all four deltas in one full-block FMA.
        dd = d * std_lane + mean_lane                      # dx@c0 dy@c1 dw@c2 dh@c3

        # Align (x2, y2) over the (x1, y1) lanes: out[l] = in[(l + 2) % 128].
        # NOTE: the circular wrap only produces values in c2/c3 lanes, which the
        # final (c < 2) select discards -- the mask and both roll shifts must
        # stay coupled.
        b_shift = pltpu.roll(b, shift=_LANE - 2, axis=1)   # x2@c0, y2@c1
        size = b_shift - b                                 # w @c0, h @c1
        ctr = b + 0.5 * size                               # cx@c0, cy@c1

        dwh = pltpu.roll(dd, shift=_LANE - 2, axis=1)      # dw@c0, dh@c1

        pred_ctr = ctr + dd * size                         # pcx@c0, pcy@c1
        # Padded / out-of-range rows just compute exp(garbage-or-0); those lanes
        # are dropped by Pallas' partial-block masking or the final slice.
        pred_size = jnp.exp(dwh) * size                    # pw @c0, ph @c1
        half = 0.5 * pred_size

        lo = pred_ctr - half                               # x1'@c0, y1'@c1
        hi = pred_ctr + half                               # x2'@c0, y2'@c1
        hi_shift = pltpu.roll(hi, shift=2, axis=1)         # x2'@c2, y2'@c3

        out_ref[...] = jnp.where(c < 2, lo, hi_shift).astype(out_ref.dtype)

    return kernel


def bbox_transform(boxes, deltas, mean=None, std=None, *, max_tile_rows=4096):
    """boxes, deltas: (B, N, 4). mean, std: 4-vectors (static). Returns (B, N, 4)."""
    B, N, C = boxes.shape
    assert C == 4 and deltas.shape == boxes.shape, "boxes/deltas must be (B, N, 4)"
    out_dtype = jnp.promote_types(boxes.dtype, deltas.dtype)

    mean4 = np.asarray([0.0, 0.0, 0.0, 0.0] if mean is None else mean,
                       np.float32).reshape(4)
    std4 = np.asarray([0.1, 0.1, 0.2, 0.2] if std is None else std,
                      np.float32).reshape(4)

    # Only pad N to the 32-box row boundary (<= 31 boxes per batch, and only
    # when N % 32 != 0).  Never pad to a tile multiple.
    n_pad = _round_up(N, _BOXES_PER_ROW)
    if n_pad != N:
        pad = ((0, 0), (0, n_pad - N), (0, 0))
        boxes = jnp.pad(boxes, pad)
        deltas = jnp.pad(deltas, pad)
    rows = n_pad // _BOXES_PER_ROW
    total_rows = B * rows

    # Flatten (B, rows) -> one leading axis (contiguous data, free reshape) so a
    # single large tile spans batch boundaries and the grid is 1-D "parallel".
    boxes_v = boxes.reshape(total_rows, _LANE)
    deltas_v = deltas.reshape(total_rows, _LANE)

    # Tile selection: up to max_tile_rows x 128 (2 MiB f32) per block; at least
    # 2 programs whenever possible so v7x uses both TensorCores.  Partial last
    # blocks are masked by Pallas (grid = cdiv).
    if total_rows <= 8:
        tile_rows = total_rows            # full-dim block is always legal
    else:
        num_tiles = max(2, _cdiv(total_rows, max_tile_rows))
        tile_rows = min(_round_up(_cdiv(total_rows, num_tiles), 8),
                        max_tile_rows)
    grid = (_cdiv(total_rows, tile_rows),)

    blk = pl.BlockSpec((tile_rows, _LANE), lambda i: (i, 0))

    in_bytes = (boxes_v.size * boxes_v.dtype.itemsize
                + deltas_v.size * deltas_v.dtype.itemsize)
    out_bytes = total_rows * _LANE * jnp.dtype(out_dtype).itemsize
    cost = pl.CostEstimate(
        flops=12 * total_rows * _LANE,
        transcendentals=total_rows * _LANE,
        bytes_accessed=int(in_bytes + out_bytes),
    )

    out_v = pl.pallas_call(
        _make_bbox_kernel(mean4, std4),
        out_shape=jax.ShapeDtypeStruct((total_rows, _LANE), out_dtype),
        grid=grid,
        in_specs=[blk, blk],
        out_specs=blk,
        compiler_params=pltpu.CompilerParams(
            dimension_semantics=("parallel",)),
        cost_estimate=cost,
    )(boxes_v, deltas_v)

    out = out_v.reshape(B, n_pad, 4)
    if n_pad != N:
        out = out[:, :N, :]
    return out


def _reference(boxes, deltas, mean, std):
    boxes = boxes.astype(jnp.float32)
    deltas = deltas.astype(jnp.float32)
    widths = boxes[:, :, 2] - boxes[:, :, 0]
    heights = boxes[:, :, 3] - boxes[:, :, 1]
    ctr_x = boxes[:, :, 0] + 0.5 * widths
    ctr_y = boxes[:, :, 1] + 0.5 * heights
    dx = deltas[:, :, 0] * std[0] + mean[0]
    dy = deltas[:, :, 1] * std[1] + mean[1]
    dw = deltas[:, :, 2] * std[2] + mean[2]
    dh = deltas[:, :, 3] * std[3] + mean[3]
    pred_ctr_x = ctr_x + dx * widths
    pred_ctr_y = ctr_y + dy * heights
    pred_w = jnp.exp(dw) * widths
    pred_h = jnp.exp(dh) * heights
    return jnp.stack([pred_ctr_x - 0.5 * pred_w,
                      pred_ctr_y - 0.5 * pred_h,
                      pred_ctr_x + 0.5 * pred_w,
                      pred_ctr_y + 0.5 * pred_h], axis=2)


if __name__ == "__main__":
    # Module defaults (the PyTorch reference has no clamp, so none here either).
    mean = np.array([0.0, 0.0, 0.0, 0.0], dtype=np.float32)
    std = np.array([0.1, 0.1, 0.2, 0.2], dtype=np.float32)

    key = jax.random.PRNGKey(0)
    kb, kd = jax.random.split(key)
    B, N = 2, 256

    # Valid-ish boxes: (x1, y1, x2, y2) with x2 > x1, y2 > y1.
    xy1 = jax.random.uniform(kb, (B, N, 2), jnp.float32, 0.0, 50.0)
    wh = jax.random.uniform(kd, (B, N, 2), jnp.float32, 1.0, 30.0)
    boxes = jnp.concatenate([xy1, xy1 + wh], axis=-1)
    deltas = jax.random.normal(jax.random.PRNGKey(1), (B, N, 4), jnp.float32) * 0.5

    out = bbox_transform(boxes, deltas, mean, std)
    jax.block_until_ready(out)
    ref = _reference(boxes, deltas, jnp.asarray(mean), jnp.asarray(std))
    assert out.shape == (B, N, 4) and out.dtype == jnp.float32
    assert jnp.allclose(out, ref, atol=1e-4, rtol=1e-4)

    # Ragged N (exercises the 32-box pad + slice path and a partial last block).
    N2 = 200
    out2 = bbox_transform(boxes[:, :N2, :], deltas[:, :N2, :], mean, std)
    jax.block_until_ready(out2)
    ref2 = _reference(boxes[:, :N2, :], deltas[:, :N2, :],
                      jnp.asarray(mean), jnp.asarray(std))
    assert jnp.allclose(out2, ref2, atol=1e-4, rtol=1e-4)

    # bf16 I/O path (native-dtype in/out, f32 math inside the kernel).
    out3 = bbox_transform(boxes.astype(jnp.bfloat16), deltas.astype(jnp.bfloat16),
                          mean, std)
    jax.block_until_ready(out3)
    assert out3.dtype == jnp.bfloat16
    assert jnp.allclose(out3.astype(jnp.float32), ref, atol=1.0, rtol=2e-2)

    print("KERNEL_OK")
</pallas_src>

<mosaic_0001>
module attributes {stable_mosaic.version = 11 : i64} {
  func.func @kernel(%arg0: i32, %arg1: memref<8x128xf32, #tpu.memory_space<vmem>>, %arg2: memref<8x128xf32, #tpu.memory_space<vmem>>, %arg3: memref<8x128xf32, #tpu.memory_space<vmem>>) attributes {dimension_semantics = [#tpu.dimension_semantics<parallel>], iteration_bounds = array<i64: 2>, scalar_prefetch = 0 : i64, scratch_operands = 0 : i64, tpu.core_type = #tpu.core_type<tc>, window_params = [{transform_indices = @transform_0, window_bounds = array<i64: 8, 128>}, {transform_indices = @transform_1, window_bounds = array<i64: 8, 128>}, {transform_indices = @transform_2, window_bounds = array<i64: 8, 128>}]} {
    %c0 = arith.constant 0 : index
    %c0_0 = arith.constant 0 : index
    %0 = vector.load %arg1[%c0, %c0_0] : memref<8x128xf32, #tpu.memory_space<vmem>>, vector<8x128xf32>
    %c0_1 = arith.constant 0 : index
    %c0_2 = arith.constant 0 : index
    %1 = vector.load %arg2[%c0_1, %c0_2] : memref<8x128xf32, #tpu.memory_space<vmem>>, vector<8x128xf32>
    %2 = tpu.iota {dimensions = array<i32: 1>} : vector<1x128xi32>
    %c3_i32 = arith.constant 3 : i32
    %3 = vector.broadcast %c3_i32 : i32 to vector<1x128xi32>
    %4 = arith.andi %2, %3 : vector<1x128xi32>
    %c0_i32 = arith.constant 0 : i32
    %5 = vector.broadcast %c0_i32 : i32 to vector<1x128xi32>
    %6 = arith.cmpi eq, %4, %5 : vector<1x128xi32>
    %c1_i32 = arith.constant 1 : i32
    %7 = vector.broadcast %c1_i32 : i32 to vector<1x128xi32>
    %8 = arith.cmpi eq, %4, %7 : vector<1x128xi32>
    %c2_i32 = arith.constant 2 : i32
    %9 = vector.broadcast %c2_i32 : i32 to vector<1x128xi32>
    %10 = arith.cmpi eq, %4, %9 : vector<1x128xi32>
    %cst = arith.constant 0.000000e+00 : f32
    %cst_3 = arith.constant 0.000000e+00 : f32
    %11 = vector.broadcast %cst : f32 to vector<1x128xf32>
    %12 = vector.broadcast %cst_3 : f32 to vector<1x128xf32>
    %13 = arith.select %10, %11, %12 : vector<1x128xi1>, vector<1x128xf32>
    %cst_4 = arith.constant 0.000000e+00 : f32
    %14 = vector.broadcast %cst_4 : f32 to vector<1x128xf32>
    %15 = arith.select %8, %14, %13 : vector<1x128xi1>, vector<1x128xf32>
    %cst_5 = arith.constant 0.000000e+00 : f32
    %16 = vector.broadcast %cst_5 : f32 to vector<1x128xf32>
    %17 = arith.select %6, %16, %15 : vector<1x128xi1>, vector<1x128xf32>
    %c0_i32_6 = arith.constant 0 : i32
    %18 = vector.broadcast %c0_i32_6 : i32 to vector<1x128xi32>
    %19 = arith.cmpi eq, %4, %18 : vector<1x128xi32>
    %c1_i32_7 = arith.constant 1 : i32
    %20 = vector.broadcast %c1_i32_7 : i32 to vector<1x128xi32>
    %21 = arith.cmpi eq, %4, %20 : vector<1x128xi32>
    %c2_i32_8 = arith.constant 2 : i32
    %22 = vector.broadcast %c2_i32_8 : i32 to vector<1x128xi32>
    %23 = arith.cmpi eq, %4, %22 : vector<1x128xi32>
    %cst_9 = arith.constant 2.000000e-01 : f32
    %cst_10 = arith.constant 2.000000e-01 : f32
    %24 = vector.broadcast %cst_9 : f32 to vector<1x128xf32>
    %25 = vector.broadcast %cst_10 : f32 to vector<1x128xf32>
    %26 = arith.select %23, %24, %25 : vector<1x128xi1>, vector<1x128xf32>
    %cst_11 = arith.constant 1.000000e-01 : f32
    %27 = vector.broadcast %cst_11 : f32 to vector<1x128xf32>
    %28 = arith.select %21, %27, %26 : vector<1x128xi1>, vector<1x128xf32>
    %cst_12 = arith.constant 1.000000e-01 : f32
    %29 = vector.broadcast %cst_12 : f32 to vector<1x128xf32>
    %30 = arith.select %19, %29, %28 : vector<1x128xi1>, vector<1x128xf32>
    %31 = vector.broadcast %30 : vector<1x128xf32> to vector<8x128xf32>
    %32 = arith.mulf %1, %31 : vector<8x128xf32>
    %33 = vector.broadcast %17 : vector<1x128xf32> to vector<8x128xf32>
    %34 = arith.addf %32, %33 : vector<8x128xf32>
    %c126_i32 = arith.constant 126 : i32
    %35 = tpu.dynamic_rotate %0 by %c126_i32 dim 1 : vector<8x128xf32>, i32 -> vector<8x128xf32>
    %36 = arith.subf %35, %0 : vector<8x128xf32>
    %cst_13 = arith.constant 5.000000e-01 : f32
    %37 = vector.broadcast %cst_13 : f32 to vector<8x128xf32>
    %38 = arith.mulf %37, %36 : vector<8x128xf32>
    %39 = arith.addf %0, %38 : vector<8x128xf32>
    %c126_i32_14 = arith.constant 126 : i32
    %40 = tpu.dynamic_rotate %34 by %c126_i32_14 dim 1 : vector<8x128xf32>, i32 -> vector<8x128xf32>
    %41 = arith.mulf %34, %36 : vector<8x128xf32>
    %42 = arith.addf %39, %41 : vector<8x128xf32>
    %43 = math.exp %40 : vector<8x128xf32>
    %44 = arith.mulf %43, %36 : vector<8x128xf32>
    %cst_15 = arith.constant 5.000000e-01 : f32
    %45 = vector.broadcast %cst_15 : f32 to vector<8x128xf32>
    %46 = arith.mulf %45, %44 : vector<8x128xf32>
    %47 = arith.subf %42, %46 : vector<8x128xf32>
    %48 = arith.addf %42, %46 : vector<8x128xf32>
    %c2_i32_16 = arith.constant 2 : i32
    %49 = tpu.dynamic_rotate %48 by %c2_i32_16 dim 1 : vector<8x128xf32>, i32 -> vector<8x128xf32>
    %c2_i32_17 = arith.constant 2 : i32
    %50 = vector.broadcast %c2_i32_17 : i32 to vector<1x128xi32>
    %51 = arith.cmpi slt, %4, %50 : vector<1x128xi32>
    %52 = vector.shape_cast %51 : vector<1x128xi1> to vector<1x128xi1>
    %53 = vector.broadcast %52 : vector<1x128xi1> to vector<8x128xi1>
    %54 = arith.select %53, %47, %49 : vector<8x128xi1>, vector<8x128xf32>
    %c0_18 = arith.constant 0 : index
    %c0_19 = arith.constant 0 : index
    %55 = vector.load %arg3[%c0_18, %c0_19] : memref<8x128xf32, #tpu.memory_space<vmem>>, vector<8x128xf32>
    tpu.vector_store %arg3[%c0_18, %c0_19], %54 {strides = array<i32>} : memref<8x128xf32, #tpu.memory_space<vmem>>, vector<8x128xf32>,
    return
  }
  func.func @transform_0(%arg0: i32) -> (i32, i32) {
    %c0_i32 = arith.constant 0 : i32
    %c0_i32_0 = arith.constant 0 : i32
    return %arg0, %c0_i32 : i32, i32
  }
  func.func @transform_1(%arg0: i32) -> (i32, i32) {
    %c0_i32 = arith.constant 0 : i32
    %c0_i32_0 = arith.constant 0 : i32
    return %arg0, %c0_i32 : i32, i32
  }
  func.func @transform_2(%arg0: i32) -> (i32, i32) {
    %c0_i32 = arith.constant 0 : i32
    %c0_i32_0 = arith.constant 0 : i32
    return %arg0, %c0_i32 : i32, i32
  }
}

</mosaic_0001>

<bundles_post_ra>
// kernel: tpu_custom_call.1
= control target key start
LH: loop header
LB: loop body
LE: loop exit
PB: predicated region body
PF: predicated region fallthrough
CT: control target
= control target key end

     0   :  { %7 = vsyncpa [#allocation3], 0  ;;  %s728_s0 = inlined_call_operand.hbm [shape: f32[16,128], index: 0, kind: input, shape index: {}]   ;;  %s729_s1 = inlined_call_operand.hbm [shape: f32[16,128], index: 1, kind: input, shape index: {}]   ;;  %s730_s2 = inlined_call_operand.hbm [shape: f32[16,128], index: 2, kind: output, shape index: {}]  }
   0x1   :  { %9 = vsyncpa [#allocation3 + $0x1], 0 }
   0x2   :  { %10 = vsyncpa [#allocation6], 0 }
   0x3   :  { %12 = vsyncpa [#allocation6 + $0x1], 0 }
   0x4   :  { %13 = vsyncpa [#allocation4], 0 }
   0x5   :  { %15 = vsyncpa [#allocation4 + $0x1], 0  ;;  %s563_s9 = smov 0   ;;  %s565_s10 = smov 0  }
   0x6   :  { %s567_s11 = smov 0   ;;  %s569_s12 = smov 0  }
   0x7 LB: > { %s584_s13 = sadd.s32 4294967295, %s543_s12   ;;  %s342_s14 = sadd.s32 4294967294, %s543_s12   ;;  %s543_s12 = sphi %s569_s12, %s741_s12   ;;  %s539_s11 = sphi %s567_s11, %s740_s11   ;;  %s535_s10 = sphi %s565_s10, %s739_s10   ;;  %s531_s9 = sphi %s563_s9, %s738_s9  }
   0x8   : > { %s588_s15 = sadd.s32 1, %s543_s12   ;;  %s28_s16 = sadd.s32 1, %s539_s11 }
   0x9   : > { %s25_s17 = ssub.s32 %s543_s12, %s588_s15  ;;  %p35_p0 = scmp.ne.s32.totalorder %s539_s11, %s535_s10 }
   0xa   : > { %p26_p1 = scmp.eq.s32.totalorder %s25_s17, 0  ;;  %p36_p2 = scmp.eq.s32.totalorder %s543_s12, 0 }
   0xb   : > { %p41_p3 = scmp.ne.s32.totalorder %s535_s10, %s531_s9  ;;  %p42_p4 = scmp.eq.s32.totalorder %s584_s13, 0 }
   0xc   : > { %s600_s18 = scalar_select %p26_p1, %s539_s11, %s28_s16  }
   0xd   : > { %p602_p5 = por %p36_p2, %p35_p0  ;;  %p606_p6 = por %p42_p4, %p41_p3 }
   0xe   : > { %p91_p7 = scmp.eq.s32.totalorder %s584_s13, 1  ;;  %p97_p8 = scmp.eq.s32.totalorder %s342_s14, 1 }
   0xf   : > { %p374_p10 = scmp.lt.s32.totalorder %s543_s12, 2  ;;  %s622_s23 = sand.u32 1, %s539_s11  }
  0x10   : > { %p613_p11 = por %p91_p7, %p35_p0  ;;  %p617_p12 = por %p97_p8, %p41_p3 }
  0x11   : > { %s346_s24 = sshll.u32 %s543_s12, 3  ;;  %s345_s25 = sshll.u32 %s622_s23, 3 }
  0x12   : > { %s125_s28 = scalar_lea.hbm %s728_s0, %s346_s24  ;;  %s121_s30 = scalar_lea.vmem [#allocation2], %s345_s25 }
  0x13   : > { %s127_s29 = sshll.u32 %s125_s28, 4  ;;  %s129_s3 = sshll.u32 %s121_s30, 4  ;;  %s128_s29 = int_to_ptr.hbm [resolvable:$true] %s127_s29  ;;  %s130_s3 = int_to_ptr.vmem [resolvable:$true] %s129_s3 }
  0x14   : > { %p631_p13 = pnand %p374_p10, %p602_p5  ;;  %p349_p0 = scmp.ge.s32.totalorder %s543_s12, 1 }
  0x15   : > { %p153_p1 = scmp.lt.s32.totalorder %s543_s12, 3  ;;  %s118_s5 = scalar_lea.sflag [#allocation3], %s622_s23 }
  0x16   : > { %s413_s6 = sshra.s32 %s128_s29, 4  ;;  %p417_p3 = pneg %p631_p13  ;;  %s414_s6 = int_to_ptr.hbm [resolvable:$true] %s413_s6 }
  0x17   : > { %s415_s7 = scalar_lea.hbm %s414_s6, 8  ;;  %s420_s16 = scalar_lea.hbm %s728_s0, 16 }
  0x18   : > { %p416_p2 = scmp.ne.s32.totalorder %s414_s6, %s415_s7  ;;  %p421_p5 = scmp.lt.s32.totalorder %s414_s6, %s728_s0 }
  0x19   : > { %p422_p8 = scmp.lt.s32.totalorder %s420_s16, %s415_s7 }
  0x1a   : > { %p418_p4 = pnand %p417_p3, %p416_p2 }
  0x1b   : > { %p423_p10 = por %p422_p8, %p421_p5 }
  0x1c   : > { %p419_p7 = pneg %p418_p4 }
  0x1e   : > { %p424_p9 = pnand %p423_p10, %p419_p7 }
  0x20   : > { %427 = shalt.err (!%p424_p9)
}
  0x21   : > { %366 = dma.hbm_to_vmem [thread:$0]  (!%p631_p13), %s128_s29, 128, %s130_s3, %s118_s5  }
  0x22   : > { %p655_p2 = pnand %p349_p0, %p153_p1  ;;  %s144_s30 = scalar_lea.hbm %s729_s1, %s346_s24 }
  0x23   : > { %s146_s6 = sshll.u32 %s144_s30, 4  ;;  %s140_s7 = scalar_lea.vmem [#allocation5], %s345_s25  ;;  %s147_s6 = int_to_ptr.hbm [resolvable:$true] %s146_s6 }
  0x24   : > { %s148_s8 = sshll.u32 %s140_s7, 4  ;;  %s137_s14 = scalar_lea.sflag [#allocation6], %s622_s23  ;;  %s149_s8 = int_to_ptr.vmem [resolvable:$true] %s148_s8 }
  0x25   : > { %s443_s16 = sshra.s32 %s147_s6, 4  ;;  %s450_s5 = scalar_lea.hbm %s729_s1, 16  ;;  %s444_s16 = int_to_ptr.hbm [resolvable:$true] %s443_s16 }
  0x26   : > { %s445_s17 = scalar_lea.hbm %s444_s16, 8  ;;  %p451_p4 = scmp.lt.s32.totalorder %s444_s16, %s729_s1 }
  0x27   : > { %p446_p9 = scmp.ne.s32.totalorder %s444_s16, %s445_s17  ;;  %p452_p7 = scmp.lt.s32.totalorder %s450_s5, %s445_s17 }
  0x29   : > { %p448_p0 = pnand %p446_p9, %p417_p3  ;;  %p453_p5 = por %p452_p7, %p451_p4 }
  0x2b   : > { %p449_p1 = pneg %p448_p0 }
  0x2d   : > { %p454_p8 = pnand %p453_p5, %p449_p1 }
  0x2f   : > { %457 = shalt.err (!%p454_p8)
}
  0x30   : > { %369 = dma.hbm_to_vmem [thread:$0]  (!%p631_p13), %s147_s6, 128, %s149_s8, %s137_s14  }
  0x31   : > { %157 = sbr.rel (%p655_p2) target bundleno = 320 (0x140), region = 28  ;;  %s677_s23 = sand.u32 (!%p655_p2), 1, %s535_s10  }
  0x32   : > { %s680_s25 = sshll.u32 (!%p655_p2), %s677_s23, 3  ;;  %s160_s27 = scalar_lea.sflag (!%p655_p2), [#allocation3], %s677_s23 }
  0x33   : > { %s163_s28 = scalar_lea.vmem (!%p655_p2), [#allocation2], %s680_s25 }
  0x36   : > { %518 = dma.done.wait (%p606_p6), %s160_s27, 128  }
  0x37   : > { %520 = vsyncadd (%p606_p6), %s160_s27, 4294967168  ;;  %s170_s4 = scalar_lea.sflag [#allocation6], %s677_s23  ;;  %s173_s26 = scalar_lea.vmem [#allocation5], %s680_s25 }
  0x38   : > { %522 = dma.done.wait (%p606_p6), %s170_s4, 128  }
  0x39   : > { %524 = vsyncadd (%p606_p6), %s170_s4, 4294967168  ;;  %v202_v0 = vlaneseq  ;;  %v201_v3 = vld [vmem:[%s173_s26] sm:$0xff]  ;;  %v545_v4 = vmov 0.2   ;;  %s546_s30 = smov 126   ;;  %v200_v8 = vld [vmem:[%s163_s28] sm:$0xff] }
  0x3a   : > { %s547_s20 = smov 2   ;;  %s354_s6 = sshll.u32 %s584_s13, 3 }
  0x3b   : > { %v203_v1 = vand.u32 127, %v202_v0  ;;  %s244_s14 = scalar_lea.hbm %s730_s2, %s354_s6  ;;  %s199_s16 = scalar_lea.vmem [#allocation7], %s680_s25 }
  0x3c   : > { %s246_s17 = sshll.u32 %s199_s16, 4  ;;  %s248_s29 = sshll.u32 %s244_s14, 4  ;;  %s247_s17 = int_to_ptr.vmem [resolvable:$true] %s246_s17  ;;  %s249_s29 = int_to_ptr.hbm [resolvable:$true] %s248_s29 }
  0x3d   : > { %v204_v2 = vand.u32 3, %v203_v1  ;;  %s234_s3 = scalar_lea.sflag [#allocation4], %s677_s23  ;;  %s487_s5 = sshra.s32 %s249_s29, 4  ;;  %s488_s5 = int_to_ptr.hbm [resolvable:$true] %s487_s5 }
  0x3e   : > { %s489_s19 = scalar_lea.hbm %s488_s5, 8  ;;  %s493_s25 = scalar_lea.hbm %s730_s2, 16 }
  0x3f   : > { %vm205_vm0 = vcmp.eq.s32.totalorder %v204_v2, 0  ;;  %vm206_vm1 = vcmp.eq.s32.totalorder %v204_v2, 1  ;;  %vm228_vm2 = vcmp.lt.s32.totalorder %v204_v2, 2  ;;  %p490_p6 = scmp.ne.s32.totalorder %s488_s5, %s489_s19  ;;  %p494_p10 = scmp.lt.s32.totalorder %s488_s5, %s730_s2 }
  0x40   : > { %v207_v5 = vsel %vm206_vm1, 0.1, %v545_v4  ;;  %p495_p2 = scmp.lt.s32.totalorder %s493_s25, %s489_s19 }
  0x41   : > { %v208_v6 = vsel %vm205_vm0, 0.1, %v207_v5  ;;  %p491_p13 = pnand %p490_p6, %p613_p11 }
  0x42   : > { %v209_v7 = vmul.f32 %v208_v6, %v201_v3  ;;  %p496_p9 = por %p495_p2, %p494_p10 }
  0x43   : > { %p492_p3 = pneg %p491_p13 }
  0x44   : > { %216 = vrot.lane.b32.xlu0 %v209_v7, %s546_s30 }
  0x45   : > { %p497_p0 = pnand %p496_p9, %p492_p3 }
  0x4c   : > { %211 = vrot.lane.b32.xlu0 %v200_v8, %s546_s30 }
  0xb6   : > { %v217_v9 = vpop.permute.xlu0 %216 }
  0xb7   : > { %v220_v10 = vmul.f32 1.442695, %v217_v9 }
  0xb9   : > { %411 = vpow2.f32 %v220_v10 }
  0xbe   : > { %v212_v11 = vpop.permute.xlu0 %211 }
  0xbf   : > { %v412_v12 = vpop.eup %411  ;;  %v213_v13 = vsub.f32 %v212_v11, %v200_v8 }
  0xc1   : > { %v214_v14 = vmul.f32 0.5, %v213_v13  ;;  %v222_v15 = vmul.f32 %v412_v12, %v213_v13  ;;  %v218_v16 = vmul.f32 %v213_v13, %v209_v7 }
  0xc3   : > { %v215_v17 = vadd.f32 %v214_v14, %v200_v8  ;;  %v223_v19 = vmul.f32 0.5, %v222_v15 }
  0xc5   : > { %v219_v18 = vadd.f32 %v218_v16, %v215_v17 }
  0xc7   : > { %v225_v20 = vadd.f32 %v223_v19, %v219_v18  ;;  %v224_v21 = vsub.f32 %v219_v18, %v223_v19 }
  0xc9   : > { %226 = vrot.lane.b32.xlu1 %v225_v20, %s547_s20 }
 0x13b   : > { %v227_v22 = vpop.permute.xlu1 %226 }
 0x13c   : > { %v231_v23 = vsel %vm228_vm2, %v224_v21, %v227_v22 }
 0x13d   : > { %232 = vst [vmem:[%s199_s16] sm:$0xff] %v231_v23 }
 0x13e   : > { %500 = shalt.err (!%p497_p0)
}
 0x13f   : > { %361 = dma.vmem_to_hbm [thread:$0]  (%p613_p11), %s247_s17, 128, %s249_s29, %s234_s3  }
 0x140 PF: > { %s260_s23 = sand.u32 1, %s531_s9   ;;  %p737_p1 = scmp.ge.s32.totalorder %s543_s12, 2 }
 0x141   : > { %s261_s4 = scalar_lea.sflag [#allocation4], %s260_s23 }
 0x142   : > { %p371_p4 = pnand %p737_p1, %p617_p12 }
 0x144   : > { %p372_p7 = pneg %p371_p4 }
 0x146   : > { %526 = dma.done.wait (%p372_p7), %s261_s4, 128  }
 0x147   : > { %528 = vsyncadd (%p372_p7), %s261_s4, 4294967168  ;;  %p18_p5 = scmp.ge.s32.totalorder %s588_s15, 4   ;;  %s738_s9 = smov %s535_s10 }
 0x148   : > { %s739_s10 = smov %s539_s11  ;;  %s740_s11 = smov %s600_s18 }
 0x149   : > { %s741_s12 = smov %s588_s15  ;;  %20 = sbr.rel (!%p18_p5) target bundleno = 7 (0x7), region = 86 }
 0x14e   :  { %267 = vsyncpa [#allocation3], 1 }
 0x14f   :  { %269 = vsyncpa [#allocation3 + $0x1], 1 }
 0x150   :  { %270 = vsyncpa [#allocation6], 1 }
 0x151   :  { %272 = vsyncpa [#allocation6 + $0x1], 1 }
 0x152   :  { %273 = vsyncpa [#allocation4], 1 }
 0x153   :  { %275 = vsyncpa [#allocation4 + $0x1], 1 }

</bundles_post_ra>
